<compile_context>
chip_gen: v7x
topology: tpu7x:2x2x1
jax: 0.10.0
libtpu: 0.0.40
codegen_flags: <defaults>
</compile_context>

<pallas_src>
import functools
import math

import jax
import jax.numpy as jnp
from jax.experimental import pallas as pl
from jax.experimental.pallas import tpu as pltpu


# Safe across generations: above the 16/32 MiB scoped defaults (v5e/v6e),
# below v7x's 64 MiB physical VMEM.
_VMEM_LIMIT_BYTES = 48 * 1024 * 1024
# Budget used when choosing row tiles (double-buffered in+out blocks).
_TILE_BUDGET_BYTES = 16 * 1024 * 1024


def _round_up(x: int, m: int) -> int:
    return ((x + m - 1) // m) * m


def _pick_row_tile(n_rows: int, d_in: int, d_out: int, itemsize: int = 4) -> int:
    """Largest row tile whose double-buffered (in + out) blocks fit the budget."""
    tm = 2048
    while tm > 8 and 2 * tm * (d_in + d_out) * itemsize > _TILE_BUDGET_BYTES:
        tm //= 2
    return int(min(tm, _round_up(n_rows, 8)))


def _compiler_params(n_parallel_axes: int = 1):
    return pltpu.CompilerParams(
        dimension_semantics=("parallel",) * n_parallel_axes,
        vmem_limit_bytes=_VMEM_LIMIT_BYTES,
    )


# ---------------------------------------------------------------------------
# Kernel 1: fused LayerNorm (torch semantics) + matmul + bias (+ optional ReLU)
# ---------------------------------------------------------------------------
def _ln_matmul_kernel(x_ref, g_ref, b_ref, w_ref, bias_ref, o_ref, *, eps, activation):
    x = x_ref[...].astype(jnp.float32)          # (tm, D)
    g = g_ref[...].astype(jnp.float32)          # (1, D)
    be = b_ref[...].astype(jnp.float32)         # (1, D)

    d = x.shape[-1]                             # NOTE: d must be > 1 (torch.std N-1)
    # Single fused pass: sum and sum-of-squares together (one XLU reduction pair).
    s1 = jnp.sum(x, axis=-1, keepdims=True)
    s2 = jnp.sum(x * x, axis=-1, keepdims=True)
    mean = s1 * (1.0 / d)
    var = (s2 - s1 * mean) * (1.0 / (d - 1))    # unbiased, torch.std default
    var = jnp.maximum(var, 0.0)
    std = jnp.sqrt(var)
    inv = pl.reciprocal(std + eps, approx=False)  # eps added to std (torch module)
    xn = (x - mean) * inv * g + be

    w = w_ref[...].astype(jnp.float32)          # (D, N)
    y = jnp.dot(xn, w, preferred_element_type=jnp.float32)
    y = y + bias_ref[...].astype(jnp.float32)
    if activation == "relu":
        y = jnp.maximum(y, 0.0)
    o_ref[...] = y.astype(o_ref.dtype)


def ln_matmul(x2, gamma, beta, w, b, *, eps, activation=None):
    """LayerNorm(x2) @ w + b (optionally ReLU). x2: (R, D); w: (D, N)."""
    R, D = x2.shape
    N = w.shape[1]
    tm = _pick_row_tile(R, D, N, x2.dtype.itemsize)
    grid = (pl.cdiv(R, tm),)
    kernel = functools.partial(_ln_matmul_kernel, eps=eps, activation=activation)
    return pl.pallas_call(
        kernel,
        out_shape=jax.ShapeDtypeStruct((R, N), x2.dtype),
        grid_spec=pltpu.PrefetchScalarGridSpec(
            num_scalar_prefetch=0,
            grid=grid,
            in_specs=[
                pl.BlockSpec((tm, D), lambda i: (i, 0)),
                pl.BlockSpec((1, D), lambda i: (0, 0)),
                pl.BlockSpec((1, D), lambda i: (0, 0)),
                pl.BlockSpec((D, N), lambda i: (0, 0)),
                pl.BlockSpec((1, N), lambda i: (0, 0)),
            ],
            out_specs=pl.BlockSpec((tm, N), lambda i: (i, 0)),
        ),
        compiler_params=_compiler_params(1),
    )(x2, gamma.reshape(1, D), beta.reshape(1, D), w, b.reshape(1, N))


# ---------------------------------------------------------------------------
# Kernel 2: matmul + bias (+ optional ReLU, + optional fused residual add)
# ---------------------------------------------------------------------------
def _matmul_bias_kernel(*refs, activation, has_residual):
    if has_residual:
        x_ref, w_ref, b_ref, r_ref, o_ref = refs
    else:
        x_ref, w_ref, b_ref, o_ref = refs
        r_ref = None
    x = x_ref[...].astype(jnp.float32)
    w = w_ref[...].astype(jnp.float32)
    y = jnp.dot(x, w, preferred_element_type=jnp.float32)
    y = y + b_ref[...].astype(jnp.float32)
    if activation == "relu":
        y = jnp.maximum(y, 0.0)
    if has_residual:
        y = y + r_ref[...].astype(jnp.float32)   # dropout is identity at inference
    o_ref[...] = y.astype(o_ref.dtype)


def matmul_bias(x2, w, b, *, residual=None, activation=None):
    """x2 @ w + b (+ residual). x2: (R, K); w: (K, N); residual: (R, N)."""
    R, K = x2.shape
    N = w.shape[1]
    has_residual = residual is not None
    tm = _pick_row_tile(R, K, N + (N if has_residual else 0), x2.dtype.itemsize)
    grid = (pl.cdiv(R, tm),)

    args = [x2, w, b.reshape(1, N)]
    in_specs = [
        pl.BlockSpec((tm, K), lambda i: (i, 0)),
        pl.BlockSpec((K, N), lambda i: (0, 0)),
        pl.BlockSpec((1, N), lambda i: (0, 0)),
    ]
    if has_residual:
        args.append(residual)
        in_specs.append(pl.BlockSpec((tm, N), lambda i: (i, 0)))

    kernel = functools.partial(
        _matmul_bias_kernel, activation=activation, has_residual=has_residual
    )
    return pl.pallas_call(
        kernel,
        out_shape=jax.ShapeDtypeStruct((R, N), x2.dtype),
        grid_spec=pltpu.PrefetchScalarGridSpec(
            num_scalar_prefetch=0,
            grid=grid,
            in_specs=in_specs,
            out_specs=pl.BlockSpec((tm, N), lambda i: (i, 0)),
        ),
        compiler_params=_compiler_params(1),
    )(*args)


# ---------------------------------------------------------------------------
# Kernel 3: scaled dot-product attention (scores -> mask -> softmax -> @ V)
# ---------------------------------------------------------------------------
def _attention_kernel(*refs, scale, has_mask):
    if has_mask:
        q_ref, k_ref, v_ref, m_ref, o_ref = refs
    else:
        q_ref, k_ref, v_ref, o_ref = refs
        m_ref = None
    q = q_ref[...].astype(jnp.float32)           # (1, Lq, dk)
    k = k_ref[...].astype(jnp.float32)           # (1, dk, Lk)  (key pre-transposed)
    v = v_ref[...].astype(jnp.float32)           # (1, Lk, dk)

    s = jnp.einsum("bqd,bdk->bqk", q, k, preferred_element_type=jnp.float32) * scale
    if has_mask:
        s = jnp.where(m_ref[...] == 0, -1e9, s)  # torch masked_fill(mask==0, -1e9)
    s = s - jnp.max(s, axis=-1, keepdims=True)
    p = jnp.exp(s)
    denom = jnp.sum(p, axis=-1, keepdims=True)
    p = p * pl.reciprocal(denom, approx=False)
    o = jnp.einsum("bqk,bkd->bqd", p, v, preferred_element_type=jnp.float32)
    o_ref[...] = o.astype(o_ref.dtype)


def attention(q, k_t, v, mask, *, scale):
    """q: (B,H,Lq,dk); k_t: (B,H,dk,Lk); v: (B,H,Lk,dk); mask broadcastable to (B,H,Lq,Lk)."""
    # TODO(synk): for long sequences this should be a flash-style tiled kernel.
    B, H, Lq, dk = q.shape
    Lk = k_t.shape[-1]
    BH = B * H
    q3 = q.reshape(BH, Lq, dk)
    k3 = k_t.reshape(BH, dk, Lk)
    v3 = v.reshape(BH, Lk, dk)

    has_mask = mask is not None
    args = [q3, k3, v3]
    in_specs = [
        pl.BlockSpec((1, Lq, dk), lambda i: (i, 0, 0)),
        pl.BlockSpec((1, dk, Lk), lambda i: (i, 0, 0)),
        pl.BlockSpec((1, Lk, dk), lambda i: (i, 0, 0)),
    ]
    if has_mask:
        m3 = jnp.broadcast_to(mask, (B, H, Lq, Lk)).reshape(BH, Lq, Lk).astype(jnp.int32)
        args.append(m3)
        in_specs.append(pl.BlockSpec((1, Lq, Lk), lambda i: (i, 0, 0)))

    kernel = functools.partial(_attention_kernel, scale=scale, has_mask=has_mask)
    out = pl.pallas_call(
        kernel,
        out_shape=jax.ShapeDtypeStruct((BH, Lq, dk), q.dtype),
        grid_spec=pltpu.PrefetchScalarGridSpec(
            num_scalar_prefetch=0,
            grid=(BH,),
            in_specs=in_specs,
            out_specs=pl.BlockSpec((1, Lq, dk), lambda i: (i, 0, 0)),
        ),
        compiler_params=_compiler_params(1),
    )(*args)
    return out.reshape(B, H, Lq, dk)


# ---------------------------------------------------------------------------
# DecoderBlock forward (Pallas) — inference mode (dropout = identity)
# ---------------------------------------------------------------------------
def decoder_block_forward(p, tgt, memory, tgt_mask=None, memory_mask=None,
                          use_cache=True, eps=1e-6):
    # TODO(synk): past_key_value cache concatenation not implemented (demo runs without it).
    B, Lt, D = tgt.shape
    _, Ls, _ = memory.shape
    H = p["n_heads"]
    dk = D // H
    scale = 1.0 / math.sqrt(dk)

    x2 = tgt.reshape(B * Lt, D)

    # ---- masked self-attention sub-layer (LN1 fused into the QKV projection) ----
    residual = x2
    wqkv = jnp.concatenate([p["sa_wq"], p["sa_wk"], p["sa_wv"]], axis=1)
    bqkv = jnp.concatenate([p["sa_bq"], p["sa_bk"], p["sa_bv"]], axis=0)
    qkv = ln_matmul(x2, p["ln1_g"], p["ln1_b"], wqkv, bqkv, eps=eps)
    q, k, v = jnp.split(qkv, 3, axis=-1)
    q4 = q.reshape(B, Lt, H, dk).transpose(0, 2, 1, 3)
    k4 = k.reshape(B, Lt, H, dk).transpose(0, 2, 3, 1)    # key layout (B,H,dk,Lt)
    v4 = v.reshape(B, Lt, H, dk).transpose(0, 2, 1, 3)
    a = attention(q4, k4, v4, tgt_mask, scale=scale)
    a2 = a.transpose(0, 2, 1, 3).reshape(B * Lt, D)
    x2 = matmul_bias(a2, p["sa_wo"], p["sa_bo"], residual=residual)
    self_present = (k4, v4) if use_cache else None

    # ---- cross-attention sub-layer (LN2 fused into the Q projection) ----
    residual = x2
    q = ln_matmul(x2, p["ln2_g"], p["ln2_b"], p["ca_wq"], p["ca_bq"], eps=eps)
    mem2 = memory.reshape(B * Ls, D)
    wkv = jnp.concatenate([p["ca_wk"], p["ca_wv"]], axis=1)
    bkv = jnp.concatenate([p["ca_bk"], p["ca_bv"]], axis=0)
    kv = matmul_bias(mem2, wkv, bkv)
    k, v = jnp.split(kv, 2, axis=-1)
    q4 = q.reshape(B, Lt, H, dk).transpose(0, 2, 1, 3)
    k4 = k.reshape(B, Ls, H, dk).transpose(0, 2, 3, 1)
    v4 = v.reshape(B, Ls, H, dk).transpose(0, 2, 1, 3)
    a = attention(q4, k4, v4, memory_mask, scale=scale)
    a2 = a.transpose(0, 2, 1, 3).reshape(B * Lt, D)
    x2 = matmul_bias(a2, p["ca_wo"], p["ca_bo"], residual=residual)
    cross_present = (k4, v4) if use_cache else None

    # ---- position-wise feed-forward sub-layer (LN3 fused into FF1 + ReLU) ----
    residual = x2
    h = ln_matmul(x2, p["ln3_g"], p["ln3_b"], p["ff_w1"], p["ff_b1"], eps=eps,
                  activation="relu")
    x2 = matmul_bias(h, p["ff_w2"], p["ff_b2"], residual=residual)

    x = x2.reshape(B, Lt, D)
    present = (self_present + cross_present) if use_cache else None
    return x, present


# ---------------------------------------------------------------------------
# Pure-JAX reference mirroring the PyTorch module (dropout = identity)
# ---------------------------------------------------------------------------
def decoder_block_reference(p, tgt, memory, tgt_mask, memory_mask, eps=1e-6):
    D = tgt.shape[-1]
    H = p["n_heads"]
    dk = D // H

    def ln(x, g, b):
        mean = jnp.mean(x, axis=-1, keepdims=True)
        std = jnp.std(x, axis=-1, keepdims=True, ddof=1)
        return g * (x - mean) / (std + eps) + b

    def lin(x, w, b):
        return jnp.einsum("...i,ij->...j", x, w, precision="highest") + b

    def split_heads(x, is_key=False):
        Bx = x.shape[0]
        x = x.reshape(Bx, -1, H, dk)
        return x.transpose(0, 2, 3, 1) if is_key else x.transpose(0, 2, 1, 3)

    def attn(q, k, v, mask):
        s = jnp.einsum("bhqd,bhdk->bhqk", q, k, precision="highest") / math.sqrt(dk)
        if mask is not None:
            s = jnp.where(mask == 0, -1e9, s)
        w = jax.nn.softmax(s, axis=-1)
        return jnp.einsum("bhqk,bhkd->bhqd", w, v, precision="highest")

    def merge(x):
        Bx = x.shape[0]
        return x.transpose(0, 2, 1, 3).reshape(Bx, -1, D)

    x = tgt
    # self attention
    residual = x
    xn = ln(x, p["ln1_g"], p["ln1_b"])
    q = split_heads(lin(xn, p["sa_wq"], p["sa_bq"]))
    k = split_heads(lin(xn, p["sa_wk"], p["sa_bk"]), is_key=True)
    v = split_heads(lin(xn, p["sa_wv"], p["sa_bv"]))
    x = lin(merge(attn(q, k, v, tgt_mask)), p["sa_wo"], p["sa_bo"]) + residual
    self_present = (k, v)
    # cross attention
    residual = x
    xn = ln(x, p["ln2_g"], p["ln2_b"])
    q = split_heads(lin(xn, p["ca_wq"], p["ca_bq"]))
    k = split_heads(lin(memory, p["ca_wk"], p["ca_bk"]), is_key=True)
    v = split_heads(lin(memory, p["ca_wv"], p["ca_bv"]))
    x = lin(merge(attn(q, k, v, memory_mask)), p["ca_wo"], p["ca_bo"]) + residual
    cross_present = (k, v)
    # feed-forward
    residual = x
    xn = ln(x, p["ln3_g"], p["ln3_b"])
    h = jax.nn.relu(lin(xn, p["ff_w1"], p["ff_b1"]))
    x = lin(h, p["ff_w2"], p["ff_b2"]) + residual
    return x, self_present + cross_present


# ---------------------------------------------------------------------------
# Parameter init (torch nn.Linear-style uniform init, deterministic)
# ---------------------------------------------------------------------------
def init_decoder_block_params(key, d_model, n_heads, d_ff):
    keys = jax.random.split(key, 10)

    def linear(k, fan_in, fan_out):
        k1, k2 = jax.random.split(k)
        bound = 1.0 / math.sqrt(fan_in)
        w = jax.random.uniform(k1, (fan_in, fan_out), jnp.float32, -bound, bound)
        b = jax.random.uniform(k2, (fan_out,), jnp.float32, -bound, bound)
        return w, b

    p = {"n_heads": n_heads}
    p["sa_wq"], p["sa_bq"] = linear(keys[0], d_model, d_model)
    p["sa_wk"], p["sa_bk"] = linear(keys[1], d_model, d_model)
    p["sa_wv"], p["sa_bv"] = linear(keys[2], d_model, d_model)
    p["sa_wo"], p["sa_bo"] = linear(keys[3], d_model, d_model)
    p["ca_wq"], p["ca_bq"] = linear(keys[4], d_model, d_model)
    p["ca_wk"], p["ca_bk"] = linear(keys[5], d_model, d_model)
    p["ca_wv"], p["ca_bv"] = linear(keys[6], d_model, d_model)
    p["ca_wo"], p["ca_bo"] = linear(keys[7], d_model, d_model)
    p["ff_w1"], p["ff_b1"] = linear(keys[8], d_model, d_ff)
    p["ff_w2"], p["ff_b2"] = linear(keys[9], d_ff, d_model)
    for i in (1, 2, 3):
        p[f"ln{i}_g"] = jnp.ones((d_model,), jnp.float32)
        p[f"ln{i}_b"] = jnp.zeros((d_model,), jnp.float32)
    return p


if __name__ == "__main__":
    batch, tgt_len, src_len = 2, 8, 12
    d_model, n_heads, d_ff = 32, 4, 64
    eps = 1e-6

    key = jax.random.PRNGKey(0)
    k_tgt, k_mem, k_par = jax.random.split(key, 3)
    tgt = jax.random.normal(k_tgt, (batch, tgt_len, d_model), jnp.float32)
    memory = jax.random.normal(k_mem, (batch, src_len, d_model), jnp.float32)
    params = init_decoder_block_params(k_par, d_model, n_heads, d_ff)

    # causal mask for the target, padding mask for the memory
    causal = jnp.tril(jnp.ones((tgt_len, tgt_len), jnp.int32))
    tgt_mask = jnp.broadcast_to(causal, (batch, 1, tgt_len, tgt_len))
    memory_mask = jnp.ones((batch, 1, 1, src_len), jnp.int32)
    memory_mask = memory_mask.at[1, :, :, -2:].set(0)

    out, present = decoder_block_forward(
        params, tgt, memory, tgt_mask, memory_mask, use_cache=True, eps=eps)
    jax.block_until_ready(out)

    ref_out, ref_present = decoder_block_reference(
        params, tgt, memory, tgt_mask, memory_mask, eps=eps)

    assert out.shape == ref_out.shape
    assert jnp.allclose(out, ref_out, atol=2e-2, rtol=2e-2), \
        float(jnp.max(jnp.abs(out - ref_out)))
    for got, want in zip(present, ref_present):
        assert got.shape == want.shape
        assert jnp.allclose(got, want, atol=2e-2, rtol=2e-2)

    print("KERNEL_OK")
</pallas_src>

<mosaic_0001>
module attributes {stable_mosaic.version = 11 : i64} {
  func.func @_ln_matmul_kernel(%arg0: i32, %arg1: memref<16x32xf32, #tpu.memory_space<vmem>>, %arg2: memref<1x32xf32, #tpu.memory_space<vmem>>, %arg3: memref<1x32xf32, #tpu.memory_space<vmem>>, %arg4: memref<32x96xf32, #tpu.memory_space<vmem>>, %arg5: memref<1x96xf32, #tpu.memory_space<vmem>>, %arg6: memref<16x96xf32, #tpu.memory_space<vmem>>) attributes {dimension_semantics = [#tpu.dimension_semantics<parallel>], iteration_bounds = array<i64: 1>, scalar_prefetch = 0 : i64, scratch_operands = 0 : i64, tpu.core_type = #tpu.core_type<tc>, window_params = [{transform_indices = @transform_0, window_bounds = array<i64: 16, 32>}, {pipeline_mode = #tpu.pipeline_mode<synchronous>, transform_indices = @transform_1, window_bounds = array<i64: 1, 32>}, {pipeline_mode = #tpu.pipeline_mode<synchronous>, transform_indices = @transform_2, window_bounds = array<i64: 1, 32>}, {pipeline_mode = #tpu.pipeline_mode<synchronous>, transform_indices = @transform_3, window_bounds = array<i64: 32, 96>}, {pipeline_mode = #tpu.pipeline_mode<synchronous>, transform_indices = @transform_4, window_bounds = array<i64: 1, 96>}, {transform_indices = @transform_5, window_bounds = array<i64: 16, 96>}]} {
    %c0 = arith.constant 0 : index
    %c0_0 = arith.constant 0 : index
    %0 = vector.load %arg1[%c0, %c0_0] : memref<16x32xf32, #tpu.memory_space<vmem>>, vector<16x32xf32>
    %c0_1 = arith.constant 0 : index
    %c0_2 = arith.constant 0 : index
    %1 = vector.load %arg2[%c0_1, %c0_2] : memref<1x32xf32, #tpu.memory_space<vmem>>, vector<1x32xf32>
    %c0_3 = arith.constant 0 : index
    %c0_4 = arith.constant 0 : index
    %2 = vector.load %arg3[%c0_3, %c0_4] : memref<1x32xf32, #tpu.memory_space<vmem>>, vector<1x32xf32>
    %cst = arith.constant dense<0.000000e+00> : vector<16xf32>
    %3 = vector.multi_reduction <add>, %0, %cst [1] : vector<16x32xf32> to vector<16xf32>
    %4 = vector.shape_cast %3 : vector<16xf32> to vector<16x1xf32>
    %5 = arith.mulf %0, %0 : vector<16x32xf32>
    %cst_5 = arith.constant dense<0.000000e+00> : vector<16xf32>
    %6 = vector.multi_reduction <add>, %5, %cst_5 [1] : vector<16x32xf32> to vector<16xf32>
    %7 = vector.shape_cast %6 : vector<16xf32> to vector<16x1xf32>
    %cst_6 = arith.constant 3.125000e-02 : f32
    %8 = vector.broadcast %cst_6 : f32 to vector<16x1xf32>
    %9 = arith.mulf %4, %8 : vector<16x1xf32>
    %10 = arith.mulf %4, %9 : vector<16x1xf32>
    %11 = arith.subf %7, %10 : vector<16x1xf32>
    %cst_7 = arith.constant 0.0322580636 : f32
    %12 = vector.broadcast %cst_7 : f32 to vector<16x1xf32>
    %13 = arith.mulf %11, %12 : vector<16x1xf32>
    %cst_8 = arith.constant 0.000000e+00 : f32
    %14 = vector.broadcast %cst_8 : f32 to vector<16x1xf32>
    %15 = arith.maximumf %13, %14 : vector<16x1xf32>
    %16 = math.sqrt %15 : vector<16x1xf32>
    %cst_9 = arith.constant 9.99999997E-7 : f32
    %17 = vector.broadcast %cst_9 : f32 to vector<16x1xf32>
    %18 = arith.addf %16, %17 : vector<16x1xf32>
    %19 = tpu.reciprocal %18 : vector<16x1xf32> -> vector<16x1xf32>
    %20 = vector.broadcast %9 : vector<16x1xf32> to vector<16x32xf32>
    %21 = arith.subf %0, %20 : vector<16x32xf32>
    %22 = vector.broadcast %19 : vector<16x1xf32> to vector<16x32xf32>
    %23 = arith.mulf %21, %22 : vector<16x32xf32>
    %24 = vector.broadcast %1 : vector<1x32xf32> to vector<16x32xf32>
    %25 = arith.mulf %23, %24 : vector<16x32xf32>
    %26 = vector.broadcast %2 : vector<1x32xf32> to vector<16x32xf32>
    %27 = arith.addf %25, %26 : vector<16x32xf32>
    %c0_10 = arith.constant 0 : index
    %c0_11 = arith.constant 0 : index
    %28 = vector.load %arg4[%c0_10, %c0_11] : memref<32x96xf32, #tpu.memory_space<vmem>>, vector<32x96xf32>
    %cst_12 = arith.constant dense<0.000000e+00> : vector<16x96xf32>
    %29 = tpu.matmul %27, %28, %cst_12 {dimension_numbers = #tpu.dot_dimension_numbers<[1], [0], [0], [1], [0, 0, 1, 1], [], []>} : vector<16x32xf32>, vector<32x96xf32>, vector<16x96xf32> -> vector<16x96xf32>
    %c0_13 = arith.constant 0 : index
    %c0_14 = arith.constant 0 : index
    %30 = vector.load %arg5[%c0_13, %c0_14] : memref<1x96xf32, #tpu.memory_space<vmem>>, vector<1x96xf32>
    %31 = vector.broadcast %30 : vector<1x96xf32> to vector<16x96xf32>
    %32 = arith.addf %29, %31 : vector<16x96xf32>
    %c0_15 = arith.constant 0 : index
    %c0_16 = arith.constant 0 : index
    %33 = vector.load %arg6[%c0_15, %c0_16] : memref<16x96xf32, #tpu.memory_space<vmem>>, vector<16x96xf32>
    tpu.vector_store %arg6[%c0_15, %c0_16], %32 {strides = array<i32>} : memref<16x96xf32, #tpu.memory_space<vmem>>, vector<16x96xf32>,
    return
  }
  func.func @transform_0(%arg0: i32) -> (i32, i32) {
    %c0_i32 = arith.constant 0 : i32
    %c0_i32_0 = arith.constant 0 : i32
    return %arg0, %c0_i32 : i32, i32
  }
  func.func @transform_1(%arg0: i32) -> (i32, i32) {
    %c0_i32 = arith.constant 0 : i32
    %c0_i32_0 = arith.constant 0 : i32
    %c0_i32_1 = arith.constant 0 : i32
    return %c0_i32, %c0_i32_0 : i32, i32
  }
  func.func @transform_2(%arg0: i32) -> (i32, i32) {
    %c0_i32 = arith.constant 0 : i32
    %c0_i32_0 = arith.constant 0 : i32
    %c0_i32_1 = arith.constant 0 : i32
    return %c0_i32, %c0_i32_0 : i32, i32
  }
  func.func @transform_3(%arg0: i32) -> (i32, i32) {
    %c0_i32 = arith.constant 0 : i32
    %c0_i32_0 = arith.constant 0 : i32
    %c0_i32_1 = arith.constant 0 : i32
    return %c0_i32, %c0_i32_0 : i32, i32
  }
  func.func @transform_4(%arg0: i32) -> (i32, i32) {
    %c0_i32 = arith.constant 0 : i32
    %c0_i32_0 = arith.constant 0 : i32
    %c0_i32_1 = arith.constant 0 : i32
    return %c0_i32, %c0_i32_0 : i32, i32
  }
  func.func @transform_5(%arg0: i32) -> (i32, i32) {
    %c0_i32 = arith.constant 0 : i32
    %c0_i32_0 = arith.constant 0 : i32
    return %arg0, %c0_i32 : i32, i32
  }
}

</mosaic_0001>

<bundles_post_ra>
// kernel: tpu_custom_call.1
= control target key start
LH: loop header
LB: loop body
LE: loop exit
PB: predicated region body
PF: predicated region fallthrough
CT: control target
= control target key end

     0   :  { %10 = vsyncpa [#allocation3], 0  ;;  %s445_s0 = inlined_call_operand.hbm [shape: f32[16,32], index: 0, kind: input, shape index: {}]   ;;  %s446_s1 = inlined_call_operand.vmem [shape: f32[1,32], index: 1, kind: input, shape index: {}]   ;;  %s447_s2 = inlined_call_operand.vmem [shape: f32[1,32], index: 2, kind: input, shape index: {}]   ;;  %s448_s3 = inlined_call_operand.hbm [shape: f32[32,96], index: 3, kind: input, shape index: {}]   ;;  %s449_s4 = inlined_call_operand.vmem [shape: f32[1,96], index: 4, kind: input, shape index: {}]   ;;  %s450_s5 = inlined_call_operand.hbm [shape: f32[16,96], index: 5, kind: output, shape index: {}]  }
   0x1   :  { %11 = vsyncpa [#allocation6], 0 }
   0x2   :  { %12 = vsyncpa [#allocation4], 0  ;;  %s344_s18 = smov [#allocation2]   ;;  %s272_s22 = scalar_lea.hbm %s445_s0, 256 }
   0x3   :  { %s18_s19 = sshll.u32 %s344_s18, 4  ;;  %p273_p0 = scmp.ne.s32.totalorder %s445_s0, %s272_s22  ;;  %s19_s19 = int_to_ptr.vmem [resolvable:$true] %s18_s19 }
   0x4   :  { %p276_p1 = scmp.lt.u32.totalorder %s272_s22, %s445_s0 }
   0x6   :  { %p278_p2 = pnand %p276_p1, %p273_p0 }
   0x8   :  { %281 = shalt.err (!%p278_p2)
}
   0x9   :  { %s282_s27 = scalar_lea.vmem %s19_s19, 256  ;;  %p287_p4 = scmp.lt.s32.totalorder %s19_s19, %s19_s19 }
   0xa   :  { %p283_p3 = scmp.ne.s32.totalorder %s19_s19, %s282_s27  ;;  %p288_p5 = scmp.lt.s32.totalorder %s282_s27, %s282_s27 }
   0xc   :  { %p289_p6 = por %p288_p5, %p287_p4 }
   0xe   :  { %p290_p7 = pnand %p289_p6, %p283_p3 }
  0x10   :  { %293 = shalt.err (!%p290_p7)
}
  0x11   :  { %s345_s28 = smov 128   ;;  %s346_s29 = smov 8  }
  0x12   :  { %24 = dma.hbm_to_vmem [thread:$0]  %s445_s0, 256, %s19_s19, [#allocation3], %s345_s28, %s345_s28, %s346_s29  }
  0x13   :  { %s347_s7 = smov [#allocation5]   ;;  %s294_s11 = scalar_lea.hbm %s448_s3, 512 }
  0x14   :  { %s34_s8 = sshll.u32 %s347_s7, 4  ;;  %p295_p8 = scmp.ne.s32.totalorder %s448_s3, %s294_s11  ;;  %s35_s8 = int_to_ptr.vmem [resolvable:$true] %s34_s8 }
  0x15   :  { %p298_p9 = scmp.lt.u32.totalorder %s294_s11, %s448_s3 }
  0x17   :  { %p300_p10 = pnand %p298_p9, %p295_p8 }
  0x19   :  { %303 = shalt.err (!%p300_p10)
}
  0x1a   :  { %s304_s16 = scalar_lea.vmem %s35_s8, 512  ;;  %p309_p12 = scmp.lt.s32.totalorder %s35_s8, %s35_s8 }
  0x1b   :  { %p305_p11 = scmp.ne.s32.totalorder %s35_s8, %s304_s16  ;;  %p310_p13 = scmp.lt.s32.totalorder %s304_s16, %s304_s16 }
  0x1d   :  { %p311_p0 = por %p310_p13, %p309_p12 }
  0x1f   :  { %p312_p1 = pnand %p311_p0, %p305_p11 }
  0x21   :  { %315 = shalt.err (!%p312_p1)
}
  0x22   :  { %40 = dma.hbm_to_vmem [thread:$0]  %s448_s3, 512, %s35_s8, [#allocation6], %s345_s28, %s345_s28, %s346_s29  }
  0x23   :  { %338 = dma.done.wait [#allocation3], 256  }
  0x24   :  { %339 = vsyncadd [#allocation3], 4294967040 }
  0x25   :  { %340 = dma.done.wait [#allocation6], 512  }
  0x26   :  { %341 = vsyncadd [#allocation6], 4294966784  ;;  %vm53_vm0 = vcmask 261120   ;;  %v49_v0 = vld [vmem:[#allocation2] sm:$0xff]  ;;  %v409_v1 = vld [vmem:[#allocation2 + $0x8] sm:$0xff]  ;;  %vm208_vm5 = vcmask 785408  }
  0x27   :  { %v54_v2 = vsel %vm53_vm0, %v49_v0, 0.0  ;;  %v60_v3 = vmul.f32 %v49_v0, %v49_v0  ;;  %v61_v4 = vmul.f32 %v409_v1, %v409_v1  ;;  %v57_v6 = vsel %vm53_vm0, %v409_v1, 0.0  ;;  %v116_v8 = vld [vmem:[#allocation5] sm:$0xff]  ;;  %v117_v9 = vld [vmem:[#allocation5 + $0x8] sm:$0xff]  ;;  %v118_v10 = vld [vmem:[#allocation5 + $0x10] sm:$0xff] }
  0x28   :  { %55 = vadd.xlane.f32.xlu0 %v54_v2  ;;  %v251_v11 = vpack.c.bf16 %v117_v9, %v116_v8  ;;  %v119_v12 = vld [vmem:[#allocation5 + $0x18] sm:$0xff]  ;;  %v229_v42 = vld [vmem:[%s446_s1] ss:$0 sm:$0xff]  ;;  %s348_s1 = smov [#allocation7]  }
  0x29   :  { %v62_v5 = vsel %vm53_vm0, %v60_v3, 0.0  ;;  %v65_v7 = vsel %vm53_vm0, %v61_v4, 0.0  ;;  %v255_v13 = vpack.c.bf16 %v119_v12, %v118_v10  ;;  %v230_v44 = vld [vmem:[%s447_s2] ss:$0 sm:$0xff]  ;;  %s216_s23 = sshll.u32 %s348_s1, 4  ;;  %s217_s23 = int_to_ptr.vmem [resolvable:$true] %s216_s23 }
  0x2a   :  { %63 = vadd.xlane.f32.xlu1 %v62_v5  ;;  %252 = vmatprep.subr.bf16.mxu0 %v251_v11  ;;  %v231_v52 = vld [vmem:[%s449_s4] ss:$0 sm:$0xff]  ;;  %s316_s2 = scalar_lea.vmem %s217_s23, 256  ;;  %p321_p3 = scmp.lt.s32.totalorder %s217_s23, %s217_s23 }
  0x2b   :  { %254 = vmatpush3.bf16.msra.mxu0 %v251_v11  ;;  %p317_p2 = scmp.ne.s32.totalorder %s217_s23, %s316_s2  ;;  %p322_p4 = scmp.lt.s32.totalorder %s316_s2, %s316_s2 }
  0x2c   :  { %58 = vadd.xlane.f32.xlu0 %v57_v6  ;;  %256 = vmatprep.subr.bf16.mxu0 %v255_v13 }
  0x2d   :  { %p323_p5 = por %p322_p4, %p321_p3 }
  0x2e   :  { %66 = vadd.xlane.f32.xlu1 %v65_v7 }
  0x2f   :  { %258 = vmatpush3.bf16.msra.mxu0 %v255_v13  ;;  %p324_p6 = pnand %p323_p5, %p317_p2 }
  0xb5   :  { %v56_v14 = vpop.xlane.xlu0 %55 }
  0xb6   :  { %v68_v15 = vmul.f32 0.03125, %v56_v14 }
  0xb7   :  { %v64_v16 = vpop.xlane.xlu1 %63 }
  0xb8   :  { %v70_v17 = vmul.f32 %v68_v15, %v56_v14  ;;  %v96_v40 = vsub.f32 %v49_v0, %v68_v15 }
  0xb9   :  { %v59_v18 = vpop.xlane.xlu0 %58 }
  0xba   :  { %v72_v19 = vsub.f32 %v64_v16, %v70_v17  ;;  %v69_v20 = vmul.f32 0.03125, %v59_v18 }
  0xbb   :  { %v67_v21 = vpop.xlane.xlu1 %66 }
  0xbc   :  { %v74_v22 = vmul.f32 0.032258064, %v72_v19  ;;  %v71_v23 = vmul.f32 %v69_v20, %v59_v18  ;;  %v97_v45 = vsub.f32 %v409_v1, %v69_v20 }
  0xbe   :  { %v76_v24 = vmax.f32 %v74_v22, 0.0  ;;  %v73_v25 = vsub.f32 %v67_v21, %v71_v23 }
  0xc0   :  { %264 = vrsqrt.f32 %v76_v24  ;;  %v75_v26 = vmul.f32 0.032258064, %v73_v25  ;;  %vm80_vm1 = vcmp.eq.f32.partialorder %v76_v24, inf  ;;  %v83_v30 = vand.u32 2147483648, %v76_v24 }
  0xc1   :  { %vm82_vm2 = vcmp.eq.f32.partialorder %v76_v24, 0.0 }
  0xc2   :  { %v77_v27 = vmax.f32 %v75_v26, 0.0 }
  0xc4   :  { %266 = vrsqrt.f32 %v77_v27  ;;  %vm87_vm3 = vcmp.eq.f32.partialorder %v77_v27, inf  ;;  %v90_v36 = vand.u32 2147483648, %v77_v27  ;;  %vm89_vm4 = vcmp.eq.f32.partialorder %v77_v27, 0.0 }
  0xca   :  { %v265_v28 = vpop.eup %264 }
  0xcb   :  { %v79_v29 = vmul.f32 %v265_v28, %v76_v24 }
  0xcd   :  { %v81_v31 = vsel %vm80_vm1, %v76_v24, %v79_v29 }
  0xce   :  { %v267_v32 = vpop.eup %266  ;;  %v84_v33 = vsel %vm82_vm2, %v83_v30, %v81_v31 }
  0xcf   :  { %v86_v34 = vmul.f32 %v267_v32, %v77_v27  ;;  %v92_v35 = vadd.f32 1e-06, %v84_v33 }
  0xd1   :  { %v88_v37 = vsel %vm87_vm3, %v77_v27, %v86_v34  ;;  %268 = vrcp.f32 %v92_v35 }
  0xd2   :  { %v91_v38 = vsel %vm89_vm4, %v90_v36, %v88_v37 }
  0xd3   :  { %v93_v39 = vadd.f32 1e-06, %v91_v38 }
  0xd5   :  { %270 = vrcp.f32 %v93_v39 }
  0xdb   :  { %v269_v41 = vpop.eup %268 }
  0xdc   :  { %v98_v43 = vmul.f32 %v269_v41, %v96_v40 }
  0xde   :  { %v106_v46 = vmul.f32 %v229_v42, %v98_v43 }
  0xdf   :  { %v271_v47 = vpop.eup %270 }
  0xe0   :  { %v99_v48 = vmul.f32 %v271_v47, %v97_v45  ;;  %v114_v49 = vadd.f32 %v230_v44, %v106_v46 }
  0xe2   :  { %v107_v50 = vmul.f32 %v229_v42, %v99_v48  ;;  %248 = vmatprep.mubr.msk.f32.mxu0 %vm53_vm0, %v114_v49 }
  0xe4   :  { %v115_v51 = vadd.f32 %v230_v44, %v107_v50 }
  0xe6   :  { %249 = vmatmul.mubr.msk.f32.vlgmr.msra.gmra.mrb[0].mxu0 %vm53_vm0, %v115_v51 }
 0x1b9   :  { %v250_v53 = vpop.f32.mrb[0].mxu0 }
 0x1ba   :  { %v205_v54 = vadd.f32 %v250_v53, %v231_v52  ;;  %v199_v55 = vpop.f32.mrb[1].mxu0 }
 0x1bb   :  { %v200_v56 = vadd.f32 %v231_v52, %v199_v55 }
 0x1bc   :  { %210 = vst.msk [vmem:[#allocation7 + $0x8] sm:$0xff] %vm208_vm5, %v205_v54 }
 0x1bd   :  { %209 = vst.msk [vmem:[#allocation7] sm:$0xff] %vm208_vm5, %v200_v56 }
 0x1be   :  { %327 = shalt.err (!%p324_p6)
}
 0x1bf   :  { %s328_s4 = scalar_lea.hbm %s450_s5, 256 }
 0x1c0   :  { %p329_p7 = scmp.ne.s32.totalorder %s450_s5, %s328_s4  ;;  %p332_p8 = scmp.lt.u32.totalorder %s328_s4, %s450_s5 }
 0x1c2   :  { %p334_p9 = pnand %p332_p8, %p329_p7 }
 0x1c4   :  { %337 = shalt.err (!%p334_p9)
}
 0x1c5   :  { %222 = dma.vmem_to_hbm [thread:$0]  %s217_s23, 256, %s450_s5, [#allocation4], %s345_s28, %s345_s28, %s346_s29  }
 0x1c6   :  { %342 = dma.done.wait [#allocation4], 256  }
 0x1c7   :  { %343 = vsyncadd [#allocation4], 4294967040 }
 0x1c8   :  { %226 = vsyncpa [#allocation3], 1 }
 0x1c9   :  { %227 = vsyncpa [#allocation6], 1 }
 0x1ca   :  { %228 = vsyncpa [#allocation4], 1 }

</bundles_post_ra>
